<compile_context>
chip_gen: v7x
topology: tpu7x:2x2x1
jax: 0.10.0
libtpu: 0.0.40
codegen_flags: <defaults>
</compile_context>

<pallas_src>
import functools

import jax
import jax.numpy as jnp
from jax.experimental import pallas as pl
from jax.experimental.pallas import tpu as pltpu

BN_EPS = 1e-5                        # nn.BatchNorm1d default
VMEM_LIMIT_BYTES = 48 * 1024 * 1024  # > v5e/v6e default scoped limits, < v7x 64 MiB
_TILE_CANDIDATES = (2048, 1024, 512, 256, 128)
_XW_RESIDENT_BYTES = 4 * 1024 * 1024  # keep xw VMEM-resident when this small


def _round_up(n, m):
    return ((n + m - 1) // m) * m


def _plan_tiles(n):
    """Pad the node axis and pick A_hat tiles.

    Pass 1 is HBM-bound on the N^2 A_hat stream, so use the biggest tiles that keep
    double-buffering comfortably inside VMEM. For large graphs keep >= 2 row tiles so
    v7x can shard the 'parallel' row axis across both TensorCores."""
    if n <= 256:
        n_pad = _round_up(n, 16)
        return n_pad, n_pad, n_pad          # single tile, toy / small graphs
    n_pad = _round_up(n, 128)
    tk = next(c for c in _TILE_CANDIDATES if n_pad % c == 0)
    tm = next(c for c in _TILE_CANDIDATES if n_pad % c == 0 and n_pad // c >= 2)
    return n_pad, tm, tk


def _pick_rows_tile(rows):
    if rows <= 2048:
        return rows
    for c in (2048, 1024, 512, 256, 128, 64, 32, 16, 8):
        if rows % c == 0:
            return c
    return rows


# --------------------------------------------------------------------------- #
# Pass 1: h = A_hat @ xw  (xw = x @ W^T precomputed), plus per-row-tile BN
#         partial statistics taken from the f32 accumulator.
# --------------------------------------------------------------------------- #
def _conv_stats_kernel(a_ref, xw_ref, h_ref, stats_ref, acc_ref, *, tk, n_k,
                       xw_resident):
    k = pl.program_id(1)

    @pl.when(k == 0)
    def _():
        acc_ref[...] = jnp.zeros_like(acc_ref)

    if xw_resident and n_k > 1:
        # xw stays VMEM-resident for the whole grid; slice the k-tile in place.
        xw = xw_ref[pl.ds(pl.multiple_of(k * tk, tk), tk), :]
    else:
        xw = xw_ref[...]

    # acc_tile += A_hat[i, k] @ xw[k]   (bf16 operands, f32 MXU accumulation)
    acc_ref[...] += jnp.dot(a_ref[...], xw, preferred_element_type=jnp.float32)

    @pl.when(k == n_k - 1)
    def _():
        h = acc_ref[...]
        # Partial per-feature BN stats from the f32 accumulator (before the bf16
        # cast); two direct stores, no concatenate on the per-row-tile epilogue.
        stats_ref[0, 0:1, :] = jnp.sum(h, axis=0, keepdims=True)
        stats_ref[0, 1:2, :] = jnp.sum(h * h, axis=0, keepdims=True)
        # bf16 h halves the writeback (and the pass-2 read); BN rescales right after,
        # so the extra rounding is benign.
        h_ref[...] = h.astype(jnp.bfloat16)


# --------------------------------------------------------------------------- #
# Pass 2: out = relu(h * scale + shift) + x   (folded BN affine + residual),
#         lane-dense [rows, 128] layout when the feature dim divides 128.
# --------------------------------------------------------------------------- #
def _bn_relu_residual_kernel(h_ref, x_ref, p_ref, o_ref):
    p = p_ref[...]                                   # [2, W]  row0=scale, row1=shift
    y = h_ref[...].astype(jnp.float32) * p[0:1, :] + p[1:2, :]   # one FMA / element
    o_ref[...] = jnp.maximum(y, 0.0) + x_ref[...]


def residual_gcn_layer(x, a_hat, weight_t, gamma, beta):
    """x: [N, D] f32 node features.
    a_hat: normalized adjacency, ideally already bf16 and padded to the planned size
           (see build_normalized_adjacency) so no per-call cast/pad traffic is paid.
    weight_t: [D_in, D_out] = GCNConv.lin.weight.T, so h = (A_hat @ x) @ weight_t.
    gamma/beta: BatchNorm1d affine params, shape [D] or [1, D].
    The GCNConv bias is intentionally not an input: a per-feature constant added
    right before BatchNorm is cancelled exactly by the mean subtraction."""
    # TODO(synk): BatchNorm1d running_mean/running_var updates (training bookkeeping)
    # are not emitted; they do not affect this forward output.
    N, D = x.shape
    n_pad, tm, tk = _plan_tiles(N)
    n_i, n_k = n_pad // tm, n_pad // tk

    if a_hat.dtype != jnp.bfloat16:            # prefer bf16-at-source (builder)
        a_hat = a_hat.astype(jnp.bfloat16)
    if a_hat.shape[0] != n_pad:                # prefer pre-padded at source
        pad_a = n_pad - a_hat.shape[0]
        a_hat = jnp.pad(a_hat, ((0, pad_a), (0, pad_a)))

    x_pad = jnp.pad(x, ((0, n_pad - N), (0, 0))) if n_pad != N else x

    # Precompute xw = x @ W^T once (tiny). Padded rows of x are zero -> padded rows
    # of xw (and of h = A_hat @ xw) are exactly zero, so BN sums stay correct.
    w_b = weight_t.astype(jnp.bfloat16)
    xw = jnp.dot(x_pad.astype(jnp.bfloat16), w_b,
                 preferred_element_type=jnp.float32).astype(jnp.bfloat16)

    xw_resident = (n_pad * D * 2) <= _XW_RESIDENT_BYTES
    xw_spec = (pl.BlockSpec((n_pad, D), lambda i, k: (0, 0)) if xw_resident
               else pl.BlockSpec((tk, D), lambda i, k: (k, 0)))

    h, partial_stats = pl.pallas_call(
        functools.partial(_conv_stats_kernel, tk=tk, n_k=n_k,
                          xw_resident=xw_resident),
        out_shape=(
            jax.ShapeDtypeStruct((n_pad, D), jnp.bfloat16),   # h (bf16)
            jax.ShapeDtypeStruct((n_i, 2, D), jnp.float32),   # per-row-tile BN stats
        ),
        grid_spec=pltpu.PrefetchScalarGridSpec(
            num_scalar_prefetch=0,
            grid=(n_i, n_k),
            in_specs=[
                pl.BlockSpec((tm, tk), lambda i, k: (i, k)),  # A_hat (dominant stream)
                xw_spec,
            ],
            out_specs=[
                pl.BlockSpec((tm, D), lambda i, k: (i, 0)),
                pl.BlockSpec((1, 2, D), lambda i, k: (i, 0, 0)),
            ],
            scratch_shapes=[pltpu.VMEM((tm, D), jnp.float32)],
        ),
        compiler_params=pltpu.CompilerParams(
            dimension_semantics=("parallel", "arbitrary"),
            vmem_limit_bytes=VMEM_LIMIT_BYTES,
        ),
    )(a_hat, xw)

    # Tiny [D]-sized glue in plain JAX: global BN stats (padded rows contribute
    # exactly zero; divide by the true N) and the folded affine.
    inv_n = 1.0 / jnp.float32(N)
    feat_sum = jnp.sum(partial_stats[:, 0, :], axis=0)
    feat_sq = jnp.sum(partial_stats[:, 1, :], axis=0)
    mean = feat_sum * inv_n
    var = jnp.maximum(feat_sq * inv_n - mean * mean, 0.0)  # biased var (BN normalization)
    inv_std = jax.lax.rsqrt(var + BN_EPS)
    scale = gamma.reshape(-1).astype(jnp.float32) * inv_std
    shift = beta.reshape(-1).astype(jnp.float32) - mean * scale

    # Lane-dense epilogue: view [n_pad, D] as [n_pad*D/128, 128] (contiguous, free
    # reshape) and tile scale/shift 128/D times so every vreg lane is used and
    # stores are unmasked. Fallback to [n_pad, D] when D does not divide 128.
    lane_dense = (128 % D == 0) and ((n_pad * D) % 128 == 0)
    if lane_dense:
        reps = 128 // D
        rows, width = n_pad * D // 128, 128
        h2 = h.reshape(rows, width)
        x2 = x_pad.reshape(rows, width)
        params = jnp.stack([jnp.tile(scale, reps), jnp.tile(shift, reps)])
    else:
        rows, width = n_pad, D
        h2, x2 = h, x_pad
        params = jnp.stack([scale, shift])

    tr = _pick_rows_tile(rows)
    # NOTE: h2 is bf16 and the output is f32, so input_output_aliases cannot reuse
    # its buffer; aliasing x2 would donate the caller's input, so it is skipped.
    out2 = pl.pallas_call(
        _bn_relu_residual_kernel,
        out_shape=jax.ShapeDtypeStruct((rows, width), jnp.float32),
        grid_spec=pltpu.PrefetchScalarGridSpec(
            num_scalar_prefetch=0,
            grid=(rows // tr,),
            in_specs=[
                pl.BlockSpec((tr, width), lambda i: (i, 0)),   # h (bf16)
                pl.BlockSpec((tr, width), lambda i: (i, 0)),   # x (residual)
                pl.BlockSpec((2, width), lambda i: (0, 0)),    # packed scale/shift
            ],
            out_specs=pl.BlockSpec((tr, width), lambda i: (i, 0)),
        ),
        compiler_params=pltpu.CompilerParams(
            dimension_semantics=("parallel",),
            vmem_limit_bytes=VMEM_LIMIT_BYTES,
        ),
    )(h2, x2, params)

    out = out2.reshape(n_pad, D)
    if n_pad != N:
        out = out[:N]
    return out


def build_normalized_adjacency(edge_index, num_nodes, pad_to=None,
                               dtype=jnp.bfloat16):
    """Dense A_hat = D^{-1/2} (A + I) D^{-1/2}, rows = destination nodes (PyG default).
    Emitted directly in bf16 (and optionally zero-padded) so the layer never pays a
    per-call cast/pad over the N^2 array."""
    src, dst = edge_index[0], edge_index[1]
    a = jnp.zeros((num_nodes, num_nodes), jnp.float32)
    a = a.at[dst, src].add(1.0)                      # message j -> i lands in row i
    a = a + jnp.eye(num_nodes, dtype=jnp.float32)    # self loops
    deg = jnp.sum(a, axis=1)
    deg_inv_sqrt = jnp.where(deg > 0, jax.lax.rsqrt(deg), 0.0)
    a_hat = (deg_inv_sqrt[:, None] * a * deg_inv_sqrt[None, :]).astype(dtype)
    if pad_to is not None and pad_to > num_nodes:
        p = pad_to - num_nodes
        a_hat = jnp.pad(a_hat, ((0, p), (0, p)))
    return a_hat


if __name__ == "__main__":
    key = jax.random.PRNGKey(0)
    k_x, k_w, k_src, k_dst = jax.random.split(key, 4)

    N = 16    # nodes
    D = 32    # feature dims (GCNConv(dims, dims))
    E = 40    # edges

    x = jax.random.normal(k_x, (N, D), dtype=jnp.float32)
    edge_index = jnp.stack([
        jax.random.randint(k_src, (E,), 0, N),
        jax.random.randint(k_dst, (E,), 0, N),
    ]).astype(jnp.int32)

    # Parameters (GCNConv(D, D) + BatchNorm1d(D)). GCNConv.lin.weight is [D_out, D_in];
    # we pass its transpose. The GCNConv bias is omitted (cancelled by BatchNorm).
    glorot_scale = jnp.sqrt(6.0 / (D + D))
    weight = jax.random.uniform(k_w, (D, D), jnp.float32, -glorot_scale, glorot_scale)
    weight_t = weight.T
    gamma = jnp.ones((1, D), jnp.float32)    # BatchNorm1d weight init
    beta = jnp.zeros((1, D), jnp.float32)    # BatchNorm1d bias init

    n_pad = _plan_tiles(N)[0]
    # A_hat built once, directly in bf16 and pre-padded: no per-call cast traffic.
    a_hat = build_normalized_adjacency(edge_index, N, pad_to=n_pad, dtype=jnp.bfloat16)

    out = jax.jit(residual_gcn_layer)(x, a_hat, weight_t, gamma, beta)
    out = jax.block_until_ready(out)

    # ---- Strict reference: mirrors the kernel numerics (bf16 operands, f32 accum,
    #      BN stats from the f32 h, bf16 h into the epilogue). ----
    x_b = x.astype(jnp.bfloat16)
    w_b = weight_t.astype(jnp.bfloat16)
    xw_b = jnp.dot(x_b, w_b, preferred_element_type=jnp.float32).astype(jnp.bfloat16)
    h32 = jnp.dot(a_hat[:N, :N], xw_b, preferred_element_type=jnp.float32)
    mean_r = jnp.mean(h32, axis=0, keepdims=True)
    var_r = jnp.maximum(jnp.mean(h32 * h32, axis=0, keepdims=True) - mean_r * mean_r, 0.0)
    scale_r = gamma * jax.lax.rsqrt(var_r + BN_EPS)
    shift_r = beta - mean_r * scale_r
    h_b = h32.astype(jnp.bfloat16).astype(jnp.float32)
    strict_ref = jnp.maximum(h_b * scale_r + shift_r, 0.0) + x
    assert jnp.allclose(out, strict_ref, atol=5e-3, rtol=5e-3), \
        "mismatch vs bf16-matched reference"

    # ---- Loose sanity check vs the pure-f32 PyTorch-semantics reference ----
    a32 = build_normalized_adjacency(edge_index, N, dtype=jnp.float32)
    h32f = a32 @ (x @ weight_t)
    m32 = jnp.mean(h32f, axis=0, keepdims=True)
    v32 = jnp.mean((h32f - m32) ** 2, axis=0, keepdims=True)
    y32 = gamma * (h32f - m32) / jnp.sqrt(v32 + BN_EPS) + beta
    ref32 = jnp.maximum(y32, 0.0) + x
    assert jnp.allclose(out, ref32, atol=5e-2, rtol=5e-2), "mismatch vs f32 reference"

    print("KERNEL_OK")
</pallas_src>

<mosaic_0001>
module attributes {stable_mosaic.version = 11 : i64} {
  func.func @_conv_stats_kernel(%arg0: i32, %arg1: i32, %arg2: memref<16x16xbf16, #tpu.memory_space<vmem>>, %arg3: memref<16x32xbf16, #tpu.memory_space<vmem>>, %arg4: memref<16x32xbf16, #tpu.memory_space<vmem>>, %arg5: memref<1x2x32xf32, #tpu.memory_space<vmem>>, %arg6: memref<16x32xf32, #tpu.memory_space<vmem>>) attributes {dimension_semantics = [#tpu.dimension_semantics<parallel>, #tpu.dimension_semantics<arbitrary>], iteration_bounds = array<i64: 1, 1>, scalar_prefetch = 0 : i64, scratch_operands = 1 : i64, tpu.core_type = #tpu.core_type<tc>, window_params = [{transform_indices = @transform_0, window_bounds = array<i64: 16, 16>}, {pipeline_mode = #tpu.pipeline_mode<synchronous>, transform_indices = @transform_1, window_bounds = array<i64: 16, 32>}, {transform_indices = @transform_2, window_bounds = array<i64: 16, 32>}, {transform_indices = @transform_3, window_bounds = array<i64: 1, 2, 32>}]} {
    %c0_i32 = arith.constant 0 : i32
    %0 = arith.cmpi eq, %arg1, %c0_i32 : i32
    %1 = arith.extui %0 : i1 to i32
    %c0_i32_0 = arith.constant 0 : i32
    %2 = arith.cmpi ne, %1, %c0_i32_0 : i32
    scf.if %2 {
      %cst_10 = arith.constant 0.000000e+00 : f32
      %12 = vector.broadcast %cst_10 : f32 to vector<16x32xf32>
      %c0_11 = arith.constant 0 : index
      %c0_12 = arith.constant 0 : index
      %13 = vector.load %arg6[%c0_11, %c0_12] : memref<16x32xf32, #tpu.memory_space<vmem>>, vector<16x32xf32>
      tpu.vector_store %arg6[%c0_11, %c0_12], %12 {strides = array<i32>} : memref<16x32xf32, #tpu.memory_space<vmem>>, vector<16x32xf32>,
    } else {
    }
    %c0 = arith.constant 0 : index
    %c0_1 = arith.constant 0 : index
    %3 = vector.load %arg3[%c0, %c0_1] : memref<16x32xbf16, #tpu.memory_space<vmem>>, vector<16x32xbf16>
    %c0_2 = arith.constant 0 : index
    %c0_3 = arith.constant 0 : index
    %4 = vector.load %arg6[%c0_2, %c0_3] : memref<16x32xf32, #tpu.memory_space<vmem>>, vector<16x32xf32>
    %c0_4 = arith.constant 0 : index
    %c0_5 = arith.constant 0 : index
    %5 = vector.load %arg2[%c0_4, %c0_5] : memref<16x16xbf16, #tpu.memory_space<vmem>>, vector<16x16xbf16>
    %cst = arith.constant dense<0.000000e+00> : vector<16x32xf32>
    %6 = tpu.matmul %5, %3, %cst {dimension_numbers = #tpu.dot_dimension_numbers<[1], [0], [0], [1], [0, 0, 1, 1], [], []>} : vector<16x16xbf16>, vector<16x32xbf16>, vector<16x32xf32> -> vector<16x32xf32>
    %7 = arith.addf %4, %6 : vector<16x32xf32>
    %c0_6 = arith.constant 0 : index
    %c0_7 = arith.constant 0 : index
    %8 = vector.load %arg6[%c0_6, %c0_7] : memref<16x32xf32, #tpu.memory_space<vmem>>, vector<16x32xf32>
    tpu.vector_store %arg6[%c0_6, %c0_7], %7 {strides = array<i32>} : memref<16x32xf32, #tpu.memory_space<vmem>>, vector<16x32xf32>,
    %c0_i32_8 = arith.constant 0 : i32
    %9 = arith.cmpi eq, %arg1, %c0_i32_8 : i32
    %10 = arith.extui %9 : i1 to i32
    %c0_i32_9 = arith.constant 0 : i32
    %11 = arith.cmpi ne, %10, %c0_i32_9 : i32
    scf.if %11 {
      %c0_10 = arith.constant 0 : index
      %c0_11 = arith.constant 0 : index
      %12 = vector.load %arg6[%c0_10, %c0_11] : memref<16x32xf32, #tpu.memory_space<vmem>>, vector<16x32xf32>
      %cst_12 = arith.constant dense<0.000000e+00> : vector<32xf32>
      %13 = vector.multi_reduction <add>, %12, %cst_12 [0] : vector<16x32xf32> to vector<32xf32>
      %14 = vector.shape_cast %13 : vector<32xf32> to vector<1x32xf32>
      %c0_13 = arith.constant 0 : index
      %c0_14 = arith.constant 0 : index
      %c0_15 = arith.constant 0 : index
      %15 = vector.load %arg5[%c0_13, %c0_14, %c0_15] : memref<1x2x32xf32, #tpu.memory_space<vmem>>, vector<1x1x32xf32>
      %16 = vector.shape_cast %15 : vector<1x1x32xf32> to vector<1x32xf32>
      %17 = vector.shape_cast %14 : vector<1x32xf32> to vector<1x1x32xf32>
      tpu.vector_store %arg5[%c0_13, %c0_14, %c0_15], %17 {strides = array<i32>} : memref<1x2x32xf32, #tpu.memory_space<vmem>>, vector<1x1x32xf32>,
      %18 = arith.mulf %12, %12 : vector<16x32xf32>
      %cst_16 = arith.constant dense<0.000000e+00> : vector<32xf32>
      %19 = vector.multi_reduction <add>, %18, %cst_16 [0] : vector<16x32xf32> to vector<32xf32>
      %20 = vector.shape_cast %19 : vector<32xf32> to vector<1x32xf32>
      %c0_17 = arith.constant 0 : index
      %c1 = arith.constant 1 : index
      %c0_18 = arith.constant 0 : index
      %21 = vector.load %arg5[%c0_17, %c1, %c0_18] : memref<1x2x32xf32, #tpu.memory_space<vmem>>, vector<1x1x32xf32>
      %22 = vector.shape_cast %21 : vector<1x1x32xf32> to vector<1x32xf32>
      %23 = vector.shape_cast %20 : vector<1x32xf32> to vector<1x1x32xf32>
      tpu.vector_store %arg5[%c0_17, %c1, %c0_18], %23 {strides = array<i32>} : memref<1x2x32xf32, #tpu.memory_space<vmem>>, vector<1x1x32xf32>,
      %24 = arith.truncf %12 : vector<16x32xf32> to vector<16x32xbf16>
      %c0_19 = arith.constant 0 : index
      %c0_20 = arith.constant 0 : index
      %25 = vector.load %arg4[%c0_19, %c0_20] : memref<16x32xbf16, #tpu.memory_space<vmem>>, vector<16x32xbf16>
      tpu.vector_store %arg4[%c0_19, %c0_20], %24 {strides = array<i32>} : memref<16x32xbf16, #tpu.memory_space<vmem>>, vector<16x32xbf16>,
    } else {
    }
    return
  }
  func.func @transform_0(%arg0: i32, %arg1: i32) -> (i32, i32) {
    %c0_i32 = arith.constant 0 : i32
    return %arg0, %arg1 : i32, i32
  }
  func.func @transform_1(%arg0: i32, %arg1: i32) -> (i32, i32) {
    %c0_i32 = arith.constant 0 : i32
    %c0_i32_0 = arith.constant 0 : i32
    %c0_i32_1 = arith.constant 0 : i32
    return %c0_i32, %c0_i32_0 : i32, i32
  }
  func.func @transform_2(%arg0: i32, %arg1: i32) -> (i32, i32) {
    %c0_i32 = arith.constant 0 : i32
    %c0_i32_0 = arith.constant 0 : i32
    return %arg0, %c0_i32 : i32, i32
  }
  func.func @transform_3(%arg0: i32, %arg1: i32) -> (i32, i32, i32) {
    %c0_i32 = arith.constant 0 : i32
    %c0_i32_0 = arith.constant 0 : i32
    %c0_i32_1 = arith.constant 0 : i32
    return %arg0, %c0_i32, %c0_i32_0 : i32, i32, i32
  }
}

module attributes {stable_mosaic.version = 11 : i64} {
  func.func @_bn_relu_residual_kernel(%arg0: i32, %arg1: memref<4x128xbf16, #tpu.memory_space<vmem>>, %arg2: memref<4x128xf32, #tpu.memory_space<vmem>>, %arg3: memref<2x128xf32, #tpu.memory_space<vmem>>, %arg4: memref<4x128xf32, #tpu.memory_space<vmem>>) attributes {dimension_semantics = [#tpu.dimension_semantics<parallel>], iteration_bounds = array<i64: 1>, scalar_prefetch = 0 : i64, scratch_operands = 0 : i64, tpu.core_type = #tpu.core_type<tc>, window_params = [{transform_indices = @transform_0, window_bounds = array<i64: 4, 128>}, {transform_indices = @transform_1, window_bounds = array<i64: 4, 128>}, {pipeline_mode = #tpu.pipeline_mode<synchronous>, transform_indices = @transform_2, window_bounds = array<i64: 2, 128>}, {transform_indices = @transform_3, window_bounds = array<i64: 4, 128>}]} {
    %c0 = arith.constant 0 : index
    %c0_0 = arith.constant 0 : index
    %0 = vector.load %arg3[%c0, %c0_0] : memref<2x128xf32, #tpu.memory_space<vmem>>, vector<2x128xf32>
    %c0_1 = arith.constant 0 : index
    %c0_2 = arith.constant 0 : index
    %1 = vector.load %arg1[%c0_1, %c0_2] : memref<4x128xbf16, #tpu.memory_space<vmem>>, vector<4x128xbf16>
    %2 = arith.extf %1 : vector<4x128xbf16> to vector<4x128xf32>
    %3 = vector.extract_strided_slice %0 {offsets = [0, 0], sizes = [1, 128], strides = [1, 1]} : vector<2x128xf32> to vector<1x128xf32>
    %4 = vector.broadcast %3 : vector<1x128xf32> to vector<4x128xf32>
    %5 = arith.mulf %2, %4 : vector<4x128xf32>
    %6 = vector.extract_strided_slice %0 {offsets = [1, 0], sizes = [1, 128], strides = [1, 1]} : vector<2x128xf32> to vector<1x128xf32>
    %7 = vector.broadcast %6 : vector<1x128xf32> to vector<4x128xf32>
    %8 = arith.addf %5, %7 : vector<4x128xf32>
    %cst = arith.constant 0.000000e+00 : f32
    %9 = vector.broadcast %cst : f32 to vector<4x128xf32>
    %10 = arith.maximumf %8, %9 : vector<4x128xf32>
    %c0_3 = arith.constant 0 : index
    %c0_4 = arith.constant 0 : index
    %11 = vector.load %arg2[%c0_3, %c0_4] : memref<4x128xf32, #tpu.memory_space<vmem>>, vector<4x128xf32>
    %12 = arith.addf %10, %11 : vector<4x128xf32>
    %c0_5 = arith.constant 0 : index
    %c0_6 = arith.constant 0 : index
    %13 = vector.load %arg4[%c0_5, %c0_6] : memref<4x128xf32, #tpu.memory_space<vmem>>, vector<4x128xf32>
    tpu.vector_store %arg4[%c0_5, %c0_6], %12 {strides = array<i32>} : memref<4x128xf32, #tpu.memory_space<vmem>>, vector<4x128xf32>,
    return
  }
  func.func @transform_0(%arg0: i32) -> (i32, i32) {
    %c0_i32 = arith.constant 0 : i32
    %c0_i32_0 = arith.constant 0 : i32
    return %arg0, %c0_i32 : i32, i32
  }
  func.func @transform_1(%arg0: i32) -> (i32, i32) {
    %c0_i32 = arith.constant 0 : i32
    %c0_i32_0 = arith.constant 0 : i32
    return %arg0, %c0_i32 : i32, i32
  }
  func.func @transform_2(%arg0: i32) -> (i32, i32) {
    %c0_i32 = arith.constant 0 : i32
    %c0_i32_0 = arith.constant 0 : i32
    %c0_i32_1 = arith.constant 0 : i32
    return %c0_i32, %c0_i32_0 : i32, i32
  }
  func.func @transform_3(%arg0: i32) -> (i32, i32) {
    %c0_i32 = arith.constant 0 : i32
    %c0_i32_0 = arith.constant 0 : i32
    return %arg0, %c0_i32 : i32, i32
  }
}

</mosaic_0001>

<bundles_post_ra>
// kernel: tile.13
= control target key start
LH: loop header
LB: loop body
LE: loop exit
PB: predicated region body
PF: predicated region fallthrough
CT: control target
= control target key end

     0   :  { %s22_s0 = inlined_call_operand.vmem [shape: f32[32], index: 0, kind: input, shape index: {}]   ;;  %s23_s1 = inlined_call_operand.vmem [shape: f32[4,32], index: 1, kind: output, shape index: {}]  }
   0x1   :  { %v4_v0 = vld [vmem:[%s22_s0] ss:$0 sm:$0xff] }
   0x2   :  { %5 = vst [vmem:[%s23_s1] sm:$0xf] %v4_v0 }

// kernel: tile.18
= control target key start
LH: loop header
LB: loop body
LE: loop exit
PB: predicated region body
PF: predicated region fallthrough
CT: control target
= control target key end

     0   :  { %vm7_vm0 = vcmask 261120   ;;  %s37_s8 = smov 32   ;;  %s38_s9 = smov 64   ;;  %vm13_vm1 = vcmask 1048320   ;;  %vm19_vm2 = vcmask 785920   ;;  %vm25_vm3 = vcmask 523520   ;;  %s55_s0 = inlined_call_operand.vmem [shape: f32[4,32], index: 0, kind: input, shape index: {}]   ;;  %s56_s1 = inlined_call_operand.vmem [shape: f32[1,128], index: 1, kind: output, shape index: {}]  }
   0x1   :  { %v4_v0 = vld [vmem:[%s55_s0] sm:$0xf]  ;;  %s36_s0 = smov 96  }
   0x2   :  { %5 = vst [vmem:[#allocation1] sm:$0xf] %v4_v0 }
   0x9   :  { %v10_v1 = vld [vmem:[#allocation1 + $0x3] sm:$0x1]   ;;  %v22_v2 = vld [vmem:[#allocation1 + $0x1] sm:$0x1]   ;;  %v6_v3 = vld [vmem:[#allocation1] sm:$0x1]  }
   0xa   :  { %11 = vrot.lane.b32.xlu0 %v10_v1, %s36_s0  ;;  %23 = vrot.lane.b32.xlu1 %v22_v2, %s37_s8  ;;  %v16_v4 = vld [vmem:[#allocation1 + $0x2] sm:$0x1]   ;;  %8 = vst.msk [vmem:[#allocation0] sm:$0x1] %vm7_vm0, %v6_v3  }
   0xe   :  { %17 = vrot.lane.b32.xlu0 %v16_v4, %s38_s9 }
  0x7c   :  { %v12_v5 = vpop.permute.xlu0 %11   ;;  %v24_v6 = vpop.permute.xlu1 %23  }
  0x7d   :  { %14 = vst.msk [vmem:[#allocation0] sm:$0x1] %vm13_vm1, %v12_v5  }
  0x80   :  { %v18_v7 = vpop.permute.xlu0 %17  }
  0x81   :  { %20 = vst.msk [vmem:[#allocation0] sm:$0x1] %vm19_vm2, %v18_v7  }
  0x82   :  { %26 = vst.msk [vmem:[#allocation0] sm:$0x1] %vm25_vm3, %v24_v6  }
  0x89   :  { %v30_v8 = vld [vmem:[#allocation0] sm:$0x1] }
  0x8a   :  { %32 = vst [vmem:[%s56_s1] sm:$0x1] %v30_v8 }

// kernel: residual_gcn_layer.3
= control target key start
LH: loop header
LB: loop body
LE: loop exit
PB: predicated region body
PF: predicated region fallthrough
CT: control target
= control target key end

     0   :  { %v17_v0 = vlaneseq  ;;  %s67_s0 = inlined_call_operand.vmem [shape: bf16[4,128], index: 0, kind: input, shape index: {}]   ;;  %s68_s2 = inlined_call_operand.vmem [shape: f32[2,128], index: 2, kind: input, shape index: {}]   ;;  %s69_s1 = inlined_call_operand.vmem [shape: f32[4,128], index: 1, kind: input, shape index: {}]   ;;  %s70_s3 = inlined_call_operand.vmem [shape: f32[4,128], index: 3, kind: output, shape index: {}]  }
   0x1   :  { %v15_v1 = vld [vmem:[%s67_s0] sm:$0x3] }
   0x2   :  { %v18_v2 = vshrl.u32 %v17_v0, 7  ;;  %v14_v3 = vld [vmem:[%s68_s2] sm:$0x3]  ;;  %v16_v4 = vunpack.c.l.bf16 %v15_v1 }
   0x3   :  { %v28_v11 = vld [vmem:[%s69_s1] sm:$0xf] }
   0x4   :  { %v19_v5 = vsub.s32 0, %v18_v2  ;;  %v24_v6 = vsub.s32 1, %v18_v2 }
   0x6   :  { %v20_v7 = vrot.slane %v14_v3, %v19_v5  ;;  %v25_v8 = vrot.slane %v14_v3, %v24_v6 }
   0x8   :  { %v21_v9 = vmul.f32 %v20_v7, %v16_v4 }
   0xa   :  { %v26_v10 = vadd.f32 %v25_v8, %v21_v9 }
   0xc   :  { %v27_v12 = vmax.f32 %v26_v10, 0.0 }
   0xe   :  { %v29_v13 = vadd.f32 %v28_v11, %v27_v12 }
  0x10   :  { %30 = vst [vmem:[%s70_s3] sm:$0xf] %v29_v13 }

// kernel: residual_gcn_layer.2
= control target key start
LH: loop header
LB: loop body
LE: loop exit
PB: predicated region body
PF: predicated region fallthrough
CT: control target
= control target key end

     0   :  { %vm18_vm0 = vcmask 261120   ;;  %v154_v0 = vmov 0.0   ;;  %vm155_vm1 = vmmov 0   ;;  %vm38_vm2 = vcmask 130048   ;;  %s202_s1 = inlined_call_operand.vmem [shape: bf16[16,32], index: 1, kind: input, shape index: {}]   ;;  %s203_s0 = inlined_call_operand.vmem [shape: bf16[16,16], index: 0, kind: input, shape index: {}]   ;;  %s204_s2 = inlined_call_operand.vmem [shape: bf16[16,32], index: 2, kind: output, shape index: {0}]   ;;  %s205_s3 = inlined_call_operand.vmem [shape: f32[1,2,32], index: 3, kind: output, shape index: {1}]  }
   0x1   :  { %19 = vst.msk [vmem:[#allocation2] sm:$0xff] %vm18_vm0, %v154_v0  ;;  %20 = vst.msk [vmem:[#allocation2 + $0x8] sm:$0xff] %vm18_vm0, %v154_v0  ;;  %144 = vmatprep.subr.bf16.mxu0 %v154_v0  ;;  %v152_v1 = vld [vmem:[%s202_s1] sm:$0xff]   ;;  %146 = vmatprep.mubr.msk.bf16.mxu0 %vm155_vm1, %v154_v0  ;;  %vm124_vm3 = vcmask 257024   ;;  %vm102_vm4 = vcmask 253952  }
   0x2   :  { %v153_v2 = vld [vmem:[%s203_s0] sm:$0xff]   ;;  %145 = vmatpush3.bf16.msra.mxu0 %v152_v1 }
   0x5   :  { %147 = vmatmul.mubr.msk.bf16.vlgmr.msra.gmra.mrb[0].mxu0 %vm38_vm2, %v153_v2 }
   0x8   :  { %v23_v3 = vld [vmem:[#allocation2] sm:$0xff]  ;;  %v24_v5 = vld [vmem:[#allocation2 + $0x8] sm:$0xff] }
  0xd8   :  { %v76_v4 = vpop.f32.mrb[0].mxu0 }
  0xd9   :  { %v83_v6 = vadd.f32 %v76_v4, %v23_v3  ;;  %v148_v7 = vpop.f32.mrb[1].mxu0 }
  0xda   :  { %v79_v8 = vpop.f32.mrb[2].mxu0 }
  0xdb   :  { %86 = vst.msk [vmem:[#allocation2] sm:$0xff] %vm18_vm0, %v83_v6  ;;  %v84_v9 = vadd.f32 %v79_v8, %v24_v5  ;;  %v149_v10 = vpop.f32.mrb[3].mxu0 }
  0xdd   :  { %87 = vst.msk [vmem:[#allocation2 + $0x8] sm:$0xff] %vm18_vm0, %v84_v9 }
  0xe2   :  { %v91_v11 = vld [vmem:[#allocation2] sm:$0xff] }
  0xe3   :  { %v104_v12 = vmul.f32 %v91_v11, %v91_v11  ;;  %v140_v13 = vpack.c.bf16 %v91_v11, %v91_v11  ;;  %v93_v15 = vsel %vm18_vm0, %v91_v11, 0.0 }
  0xe4   :  { %v92_v14 = vld [vmem:[#allocation2 + $0x8] sm:$0xff] }
  0xe5   :  { %125 = vst.msk [vmem:[%s204_s2] sm:$0xf] %vm124_vm3, %v140_v13  ;;  %v94_v16 = vsel %vm18_vm0, %v92_v14, 0.0  ;;  %v105_v17 = vmul.f32 %v92_v14, %v92_v14  ;;  %v141_v18 = vpack.c.bf16 %v92_v14, %v92_v14  ;;  %v106_v20 = vsel %vm18_vm0, %v104_v12, 0.0 }
  0xe6   :  { %v95_v19 = vadd.f32 %v94_v16, %v93_v15 }
  0xe7   :  { %v107_v21 = vsel %vm18_vm0, %v105_v17, 0.0  ;;  %126 = vst.msk [vmem:[%s204_s2 + $0x4] sm:$0xf] %vm124_vm3, %v141_v18 }
  0xe8   :  { %v96_v22 = vrot.slane %v95_v19, 4  ;;  %v108_v23 = vadd.f32 %v107_v21, %v106_v20 }
  0xea   :  { %v97_v24 = vadd.f32 %v96_v22, %v95_v19  ;;  %v109_v25 = vrot.slane %v108_v23, 4 }
  0xec   :  { %v98_v26 = vrot.slane %v97_v24, 2  ;;  %v110_v27 = vadd.f32 %v109_v25, %v108_v23 }
  0xee   :  { %v99_v28 = vadd.f32 %v98_v26, %v97_v24  ;;  %v111_v29 = vrot.slane %v110_v27, 2 }
  0xf0   :  { %v100_v30 = vrot.slane %v99_v28, 1  ;;  %v112_v31 = vadd.f32 %v111_v29, %v110_v27 }
  0xf2   :  { %v101_v32 = vadd.f32 %v100_v30, %v99_v28  ;;  %v113_v33 = vrot.slane %v112_v31, 1 }
  0xf4   :  { %103 = vst.msk [vmem:[%s205_s3] sm:$0x1] %vm102_vm4, %v101_v32  ;;  %v114_v34 = vadd.f32 %v113_v33, %v112_v31 }
  0xf6   :  { %115 = vst.msk [vmem:[%s205_s3 + $0x1] sm:$0x1] %vm102_vm4, %v114_v34 }

</bundles_post_ra>
